<compile_context>
chip_gen: v5e
topology: v5e:2x2
jax: 0.10.0
libtpu: 0.0.40
codegen_flags: <defaults>
</compile_context>

<pallas_src>
import jax
import jax.numpy as jnp
from jax import lax
from jax.experimental import pallas as pl
from jax.experimental.pallas import tpu as pltpu

EPS = 0.001          # matches self.eps in the PyTorch module: sqrt(d*d + eps)
LANES = 128
SUBLANES = 8
TARGET_BLOCK_BYTES = 2 * 1024 * 1024   # ~2 MiB per input block (mem-bound stream)


def _round_up(a, m):
    return ((a + m - 1) // m) * m


def _num_tensorcores():
    """Best-effort TensorCore count per chip; defaults to 1 (always safe)."""
    try:
        info = pltpu.get_tpu_info()
    except Exception:
        return 1
    for name in ("num_cores", "core_count", "num_tensorcores",
                 "tensorcore_count", "cores_per_chip"):
        v = getattr(info, name, None)
        if isinstance(v, int) and v >= 1:
            return v
    return 1


def _make_kernel(tile_r, steps_per_core, num_blocks, rows, ncores):
    groups = tile_r // SUBLANES
    rows_last = rows - (num_blocks - 1) * tile_r          # valid rows in final block
    has_partial = rows_last != tile_r                     # static (trace-time)
    has_redundant = ncores * steps_per_core != num_blocks # static (trace-time)
    two_axes = ncores > 1

    def kernel(x_ref, y_ref, o_ref):
        # o_ref is a (1, 8, 128) f32 partial-sum block, resident across the
        # inner ("arbitrary") grid axis for the current core.
        if two_axes:
            step = pl.program_id(1)
            blk = pl.program_id(0) * steps_per_core + step
        else:
            step = pl.program_id(0)
            blk = step

        @pl.when(step == 0)
        def _():
            o_ref[...] = jnp.zeros_like(o_ref)

        # Read in native dtype, compute in f32 (no wrapper-side casts).
        diff = x_ref[...].astype(jnp.float32) - y_ref[...].astype(jnp.float32)
        err = jnp.sqrt(diff * diff + EPS)

        def _accumulate(e):
            # Leading-axis VPU reduce into the resident (8,128) accumulator;
            # the cross-lane/sublane collapse is deferred to the wrapper.
            o_ref[...] += e.reshape(1, groups, SUBLANES, LANES).sum(axis=1)

        if not has_partial and not has_redundant:
            _accumulate(err)                  # unmasked fast path on every step
        else:
            last = num_blocks - 1
            interior = (blk < last) if has_partial else (blk <= last)

            @pl.when(interior)
            def _():
                _accumulate(err)              # unmasked fast path, interior blocks

            if has_partial:
                @pl.when(blk == last)
                def _():
                    # Only the final (partial) row-block pays the mask.
                    row = lax.broadcasted_iota(jnp.int32, (tile_r, LANES), 0)
                    _accumulate(jnp.where(row < rows_last, err, 0.0))

    return kernel


def l1_charbonnier_loss(x, y):
    """mean(sqrt((x - y)^2 + eps)) -- same semantics as the PyTorch module."""
    assert x.shape == y.shape, "X and Y must have the same shape"
    n = x.size
    xf = x.reshape(-1)
    yf = y.reshape(-1)

    tail = n % LANES
    n_main = n - tail

    total = jnp.float32(0.0)
    if tail:
        # < 128-element tail folded directly in the wrapper (no O(N) pad copy).
        dt = xf[n_main:].astype(jnp.float32) - yf[n_main:].astype(jnp.float32)
        total = total + jnp.sum(jnp.sqrt(dt * dt + EPS))

    if n_main:
        rows = n_main // LANES
        if tail:
            # TODO(synk): a 1-D-block kernel would avoid this prefix-slice copy
            # for misaligned n; the common aligned case below is zero-copy.
            x2 = xf[:n_main].reshape(rows, LANES)
            y2 = yf[:n_main].reshape(rows, LANES)
        else:
            x2 = xf.reshape(rows, LANES)      # free bitcast
            y2 = yf.reshape(rows, LANES)

        isz_x = jnp.dtype(x.dtype).itemsize
        isz_y = jnp.dtype(y.dtype).itemsize
        # Packed-sublane row multiple: 8 for 32-bit, 16 for bf16, 32 for int8/fp8.
        row_multiple = SUBLANES * max(1, 4 // min(isz_x, isz_y))
        cap_rows = max(
            row_multiple,
            (TARGET_BLOCK_BYTES // (LANES * max(isz_x, isz_y)))
            // row_multiple * row_multiple,
        )
        tile_r = min(_round_up(rows, row_multiple), cap_rows)
        num_blocks = pl.cdiv(rows, tile_r)

        ncores = min(_num_tensorcores(), num_blocks)
        if ncores > 1:
            # Multi-TensorCore chip (e.g. v7x): shard the row range across cores.
            steps_per_core = pl.cdiv(num_blocks, ncores)
            grid = (ncores, steps_per_core)
            core_sem = getattr(pltpu, "CORE_PARALLEL", "parallel")
            dim_sem = (core_sem, "arbitrary")
            # Clamp so any redundant trailing step re-reads the last valid block;
            # its contribution is skipped inside the kernel.
            in_map = lambda c, i: (jnp.minimum(c * steps_per_core + i,
                                               num_blocks - 1), 0)
            out_map = lambda c, i: (c, 0, 0)
        else:
            # Single-TensorCore chip (v5e/v6e): one flat reduction axis, no
            # clamped/redundant blocks.
            steps_per_core = num_blocks
            grid = (num_blocks,)
            dim_sem = ("arbitrary",)
            in_map = lambda i: (i, 0)
            out_map = lambda i: (0, 0, 0)

        kernel = _make_kernel(tile_r, steps_per_core, num_blocks, rows, ncores)

        partials = pl.pallas_call(
            kernel,
            out_shape=jax.ShapeDtypeStruct((ncores, SUBLANES, LANES), jnp.float32),
            grid_spec=pltpu.PrefetchScalarGridSpec(
                num_scalar_prefetch=0,
                grid=grid,
                in_specs=[
                    pl.BlockSpec((tile_r, LANES), in_map),
                    pl.BlockSpec((tile_r, LANES), in_map),
                ],
                out_specs=pl.BlockSpec((1, SUBLANES, LANES), out_map),
            ),
            compiler_params=pltpu.CompilerParams(
                dimension_semantics=dim_sem,
                vmem_limit_bytes=32 * 1024 * 1024,
            ),
        )(x2, y2)

        # Final cross-lane collapse of the per-core (8,128) partials.
        total = total + jnp.sum(partials)

    return total / jnp.float32(n)


def _reference_loss(x, y):
    diff = x.astype(jnp.float32) - y.astype(jnp.float32)
    return jnp.mean(jnp.sqrt(diff * diff + EPS))


if __name__ == "__main__":
    key = jax.random.PRNGKey(0)
    kx, ky = jax.random.split(key)
    # Shapes consistent with a typical NCHW image pair fed to this loss.
    X = jax.random.normal(kx, (2, 4, 16, 16), dtype=jnp.float32)
    Y = jax.random.normal(ky, (2, 4, 16, 16), dtype=jnp.float32)

    loss = jax.block_until_ready(l1_charbonnier_loss(X, Y))
    ref = jax.block_until_ready(_reference_loss(X, Y))

    assert jnp.allclose(loss, ref, rtol=1e-5, atol=1e-6), (loss, ref)
    print("KERNEL_OK")
</pallas_src>

<mosaic_0001>
module attributes {stable_mosaic.version = 11 : i64} {
  func.func @kernel(%arg0: i32, %arg1: memref<16x128xf32, #tpu.memory_space<vmem>>, %arg2: memref<16x128xf32, #tpu.memory_space<vmem>>, %arg3: memref<1x8x128xf32, #tpu.memory_space<vmem>>) attributes {dimension_semantics = [#tpu.dimension_semantics<arbitrary>], iteration_bounds = array<i64: 1>, scalar_prefetch = 0 : i64, scratch_operands = 0 : i64, tpu.core_type = #tpu.core_type<tc>, window_params = [{transform_indices = @transform_0, window_bounds = array<i64: 16, 128>}, {transform_indices = @transform_1, window_bounds = array<i64: 16, 128>}, {pipeline_mode = #tpu.pipeline_mode<synchronous>, transform_indices = @transform_2, window_bounds = array<i64: 1, 8, 128>}]} {
    %c0_i32 = arith.constant 0 : i32
    %0 = arith.cmpi eq, %arg0, %c0_i32 : i32
    %1 = arith.extui %0 : i1 to i32
    %c0_i32_0 = arith.constant 0 : i32
    %2 = arith.cmpi ne, %1, %c0_i32_0 : i32
    scf.if %2 {
      %cst_11 = arith.constant 0.000000e+00 : f32
      %15 = vector.broadcast %cst_11 : f32 to vector<1x8x128xf32>
      %c0_12 = arith.constant 0 : index
      %c0_13 = arith.constant 0 : index
      %c0_14 = arith.constant 0 : index
      %16 = vector.load %arg3[%c0_12, %c0_13, %c0_14] : memref<1x8x128xf32, #tpu.memory_space<vmem>>, vector<1x8x128xf32>
      tpu.vector_store %arg3[%c0_12, %c0_13, %c0_14], %15 {strides = array<i32>} : memref<1x8x128xf32, #tpu.memory_space<vmem>>, vector<1x8x128xf32>,
    } else {
    }
    %c0 = arith.constant 0 : index
    %c0_1 = arith.constant 0 : index
    %3 = vector.load %arg1[%c0, %c0_1] : memref<16x128xf32, #tpu.memory_space<vmem>>, vector<16x128xf32>
    %c0_2 = arith.constant 0 : index
    %c0_3 = arith.constant 0 : index
    %4 = vector.load %arg2[%c0_2, %c0_3] : memref<16x128xf32, #tpu.memory_space<vmem>>, vector<16x128xf32>
    %5 = arith.subf %3, %4 : vector<16x128xf32>
    %6 = arith.mulf %5, %5 : vector<16x128xf32>
    %cst = arith.constant 1.000000e-03 : f32
    %7 = vector.broadcast %cst : f32 to vector<16x128xf32>
    %8 = arith.addf %6, %7 : vector<16x128xf32>
    %9 = math.sqrt %8 : vector<16x128xf32>
    %c0_4 = arith.constant 0 : index
    %c0_5 = arith.constant 0 : index
    %c0_6 = arith.constant 0 : index
    %10 = vector.load %arg3[%c0_4, %c0_5, %c0_6] : memref<1x8x128xf32, #tpu.memory_space<vmem>>, vector<1x8x128xf32>
    %11 = vector.shape_cast %9 : vector<16x128xf32> to vector<1x2x8x128xf32>
    %cst_7 = arith.constant dense<0.000000e+00> : vector<1x8x128xf32>
    %12 = vector.multi_reduction <add>, %11, %cst_7 [1] : vector<1x2x8x128xf32> to vector<1x8x128xf32>
    %13 = arith.addf %10, %12 : vector<1x8x128xf32>
    %c0_8 = arith.constant 0 : index
    %c0_9 = arith.constant 0 : index
    %c0_10 = arith.constant 0 : index
    %14 = vector.load %arg3[%c0_8, %c0_9, %c0_10] : memref<1x8x128xf32, #tpu.memory_space<vmem>>, vector<1x8x128xf32>
    tpu.vector_store %arg3[%c0_8, %c0_9, %c0_10], %13 {strides = array<i32>} : memref<1x8x128xf32, #tpu.memory_space<vmem>>, vector<1x8x128xf32>,
    return
  }
  func.func @transform_0(%arg0: i32) -> (i32, i32) {
    %c0_i32 = arith.constant 0 : i32
    %c0_i32_0 = arith.constant 0 : i32
    return %arg0, %c0_i32 : i32, i32
  }
  func.func @transform_1(%arg0: i32) -> (i32, i32) {
    %c0_i32 = arith.constant 0 : i32
    %c0_i32_0 = arith.constant 0 : i32
    return %arg0, %c0_i32 : i32, i32
  }
  func.func @transform_2(%arg0: i32) -> (i32, i32, i32) {
    %c0_i32 = arith.constant 0 : i32
    %c0_i32_0 = arith.constant 0 : i32
    %c0_i32_1 = arith.constant 0 : i32
    %c0_i32_2 = arith.constant 0 : i32
    return %c0_i32, %c0_i32_0, %c0_i32_1 : i32, i32, i32
  }
}

</mosaic_0001>

<bundles_post_ra>
// kernel: tpu_custom_call.1
= control target key start
LH: loop header
LB: loop body
LE: loop exit
PB: predicated region body
PF: predicated region fallthrough
CT: control target
= control target key end

     0   :  { %7 = vsyncpa [#allocation3], 0  ;;  %s222_s0 = inlined_call_operand.hbm [shape: f32[16,128], index: 0, kind: input, shape index: {}]   ;;  %s223_s1 = inlined_call_operand.hbm [shape: f32[16,128], index: 1, kind: input, shape index: {}]   ;;  %s224_s2 = inlined_call_operand.hbm [shape: f32[1,8,128], index: 2, kind: output, shape index: {}]  }
   0x1   :  { %8 = vsyncpa [#allocation6], 0 }
   0x2   :  { %9 = vsyncpa [#allocation4], 0  ;;  %s14_s11 = sshll.u32 %s222_s0, 4  ;;  %s193_s12 = smov [#allocation2]   ;;  %s15_s11 = int_to_ptr.hbm [resolvable:$true] %s14_s11 }
   0x3   :  { %s16_s13 = sshll.u32 %s193_s12, 4  ;;  %s27_s16 = sshll.u32 %s223_s1, 4  ;;  %s17_s13 = int_to_ptr.vmem [resolvable:$true] %s16_s13  ;;  %s28_s16 = int_to_ptr.hbm [resolvable:$true] %s27_s16 }
   0x4   :  { %s194_s17 = smov 128   ;;  %s195_s18 = smov 8  }
   0x5   :  { %22 = dma.hbm_to_vmem [thread:$0]  %s15_s11, 256, %s17_s13, [#allocation3], %s194_s17, %s194_s17, %s195_s18  }
   0x6   :  { %s196_s19 = smov [#allocation5]  }
   0x7   :  { %s29_s20 = sshll.u32 %s196_s19, 4  ;;  %s30_s20 = int_to_ptr.vmem [resolvable:$true] %s29_s20 }
   0x8   :  { %35 = dma.hbm_to_vmem [thread:$0]  %s28_s16, 256, %s30_s20, [#allocation6], %s194_s17, %s194_s17, %s195_s18  }
   0x9   :  { %187 = dma.done.wait [#allocation3], 256  }
   0xa   :  { %188 = vsyncadd [#allocation3], 4294967040 }
   0xb   :  { %189 = dma.done.wait [#allocation6], 256  }
   0xc   :  { %190 = vsyncadd [#allocation6], 4294967040  ;;  %v49_v0 = vld [vmem:[#allocation2] sm:$0xff]  ;;  %v50_v1 = vld [vmem:[#allocation2 + $0x8] sm:$0xff]  ;;  %s197_s0 = smov [#allocation7]   ;;  %s94_s23 = sshll.u32 %s224_s2, 4  ;;  %s95_s23 = int_to_ptr.hbm [resolvable:$true] %s94_s23 }
   0xd   :  { %v51_v2 = vld [vmem:[#allocation5] sm:$0xff]  ;;  %v52_v3 = vld [vmem:[#allocation5 + $0x8] sm:$0xff]  ;;  %s92_s1 = sshll.u32 %s197_s0, 4  ;;  %s93_s1 = int_to_ptr.vmem [resolvable:$true] %s92_s1 }
   0xe   :  { %v53_v4 = vsub.f32 %v49_v0, %v51_v2  ;;  %v54_v5 = vsub.f32 %v50_v1, %v52_v3 }
  0x10   :  { %v55_v6 = vmul.f32 %v53_v4, %v53_v4  ;;  %v56_v7 = vmul.f32 %v54_v5, %v54_v5 }
  0x12   :  { %v57_v8 = vadd.f32 0.001, %v55_v6  ;;  %v58_v9 = vadd.f32 0.001, %v56_v7 }
  0x14   :  { %111 = vrsqrt.f32 %v57_v8  ;;  %vm66_vm0 = vcmp.eq.f32.partialorder %v57_v8, inf  ;;  %v69_v21 = vand.u32 2147483648, %v57_v8  ;;  %vm68_vm1 = vcmp.eq.f32.partialorder %v57_v8, 0.0 }
  0x15   :  { %113 = vrsqrt.f32 %v58_v9  ;;  %vm78_vm2 = vcmp.eq.f32.partialorder %v58_v9, inf  ;;  %v81_v24 = vand.u32 2147483648, %v58_v9  ;;  %vm80_vm3 = vcmp.eq.f32.partialorder %v58_v9, 0.0 }
  0x1a   :  { %v112_v10 = vpop.eup %111 }
  0x1b   :  { %v114_v11 = vpop.eup %113  ;;  %v60_v12 = vmul.f32 %v112_v10, %v57_v8 }
  0x1c   :  { %v72_v13 = vmul.f32 %v114_v11, %v58_v9 }
  0x1d   :  { %v61_v14 = vmul.f32 %v112_v10, %v60_v12 }
  0x1e   :  { %v73_v15 = vmul.f32 %v114_v11, %v72_v13 }
  0x1f   :  { %v62_v16 = vmul.f32 0.5, %v61_v14 }
  0x20   :  { %v74_v17 = vmul.f32 0.5, %v73_v15 }
  0x21   :  { %v63_v18 = vsub.f32 1.5, %v62_v16 }
  0x22   :  { %v75_v19 = vsub.f32 1.5, %v74_v17 }
  0x23   :  { %v64_v20 = vmul.f32 %v112_v10, %v63_v18 }
  0x24   :  { %v76_v22 = vmul.f32 %v114_v11, %v75_v19 }
  0x25   :  { %v65_v23 = vmul.f32 %v64_v20, %v57_v8 }
  0x26   :  { %v77_v25 = vmul.f32 %v76_v22, %v58_v9 }
  0x27   :  { %v67_v26 = vsel %vm66_vm0, %v57_v8, %v65_v23 }
  0x28   :  { %v70_v27 = vsel %vm68_vm1, %v69_v21, %v67_v26  ;;  %v79_v28 = vsel %vm78_vm2, %v58_v9, %v77_v25 }
  0x29   :  { %v82_v29 = vsel %vm80_vm3, %v81_v24, %v79_v28 }
  0x2a   :  { %v84_v30 = vadd.f32 %v82_v29, %v70_v27 }
  0x2c   :  { %86 = vst [vmem:[#allocation7] sm:$0xff] %v84_v30 }
  0x2d   :  { %97 = dma.vmem_to_hbm [thread:$0]  %s93_s1, 128, %s95_s23, [#allocation4]  }
  0x2e   :  { %191 = dma.done.wait [#allocation4], 128  }
  0x2f   :  { %192 = vsyncadd [#allocation4], 4294967168 }
  0x30   :  { %102 = vsyncpa [#allocation3], 1 }
  0x31   :  { %103 = vsyncpa [#allocation6], 1 }
  0x32   :  { %104 = vsyncpa [#allocation4], 1 }

</bundles_post_ra>
